<compile_context>
chip_gen: v7x
topology: tpu7x:2x2x1
jax: 0.10.0
libtpu: 0.0.40
codegen_flags: <defaults>
</compile_context>

<pallas_src>
import functools

import jax
import jax.numpy as jnp
from jax.experimental import pallas as pl
from jax.experimental.pallas import tpu as pltpu


_PARALLEL_1D = pltpu.CompilerParams(
    dimension_semantics=("parallel",),
    vmem_limit_bytes=48 * 1024 * 1024,   # stays under v7x's 64 MiB physical VMEM
)


def _row_block(n, max_rows=256):
    """Largest row tile (multiple of 8, <= max_rows) dividing n; else full n."""
    if n <= max_rows:
        return n
    for cand in range(max_rows, 7, -8):
        if n % cand == 0:
            return cand
    return n


# --------------------------------------------------------------------------
# Pallas kernels
# --------------------------------------------------------------------------
def _proj_posadd_kernel(x_ref, w_ref, b_ref, pos_ref, o_ref):
    """One batch element: (x @ W + b) + pos_embed."""
    acc = jnp.dot(x_ref[0].astype(jnp.bfloat16),
                  w_ref[...].astype(jnp.bfloat16),
                  preferred_element_type=jnp.float32)
    o_ref[0] = (acc + b_ref[0] + pos_ref[0].astype(jnp.float32)).astype(o_ref.dtype)


def pallas_proj_posadd(x, w, b, pos):
    """x: [B, T, Din] -> [B, T, D], fused with positional-embedding add."""
    B, T, Din = x.shape
    D = w.shape[1]
    return pl.pallas_call(
        _proj_posadd_kernel,
        out_shape=jax.ShapeDtypeStruct((B, T, D), x.dtype),
        grid=(B,),
        in_specs=[pl.BlockSpec((1, T, Din), lambda i: (i, 0, 0)),
                  pl.BlockSpec((Din, D), lambda i: (0, 0)),
                  pl.BlockSpec((1, 1, D), lambda i: (0, 0, 0)),
                  pl.BlockSpec((1, T, D), lambda i: (0, 0, 0))],
        out_specs=pl.BlockSpec((1, T, D), lambda i: (i, 0, 0)),
        compiler_params=_PARALLEL_1D,
    )(x, w, b.reshape(1, 1, D), pos)


def _attn_block_kernel(x_ref, g1_ref, b1_ref, wqkv_ref, bqkv_ref, wp_ref, bp_ref,
                       o_ref, *, num_heads, scale, eps):
    """One batch element: x + Proj(MHSA(LN1(x) @ Wqkv)).  Fully fused."""
    f32, bf16 = jnp.float32, jnp.bfloat16
    T = x_ref.shape[1]
    D = x_ref.shape[2]
    dh = D // num_heads

    x = x_ref[0].astype(f32)                                   # [T, D]
    mu = jnp.mean(x, axis=-1, keepdims=True)
    var = jnp.mean(jnp.square(x - mu), axis=-1, keepdims=True)
    ln = (x - mu) * jax.lax.rsqrt(var + eps) * g1_ref[0] + b1_ref[0]

    qkv = jnp.dot(ln.astype(bf16), wqkv_ref[...].astype(bf16),
                  preferred_element_type=f32) + bqkv_ref[0]    # [T, 3D]

    acc = jnp.zeros((T, D), f32)
    for h in range(num_heads):
        lo = h * dh
        q = qkv[:, lo:lo + dh]
        k = qkv[:, D + lo:D + lo + dh]
        v = qkv[:, 2 * D + lo:2 * D + lo + dh]
        # contract last axes directly (no materialized K transpose)
        s = jax.lax.dot_general(
            q.astype(bf16), k.astype(bf16),
            (((1,), (1,)), ((), ())),
            preferred_element_type=f32) * scale
        s = s - jnp.max(s, axis=-1, keepdims=True)
        p = jnp.exp(s)
        p = p * pl.reciprocal(jnp.sum(p, axis=-1, keepdims=True), approx=True)
        oh = jnp.dot(p.astype(bf16), v.astype(bf16),
                     preferred_element_type=f32)               # [T, dh]
        acc = acc + jnp.dot(oh.astype(bf16),
                            wp_ref[lo:lo + dh, :].astype(bf16),
                            preferred_element_type=f32)
    o_ref[0] = (x + acc + bp_ref[0]).astype(o_ref.dtype)


def pallas_attn_block(x, p, num_heads, eps=1e-5):
    """x + Proj(MHSA(LN1(x))).  x: [B, T, D]."""
    B, T, D = x.shape
    dh = D // num_heads
    scale = 1.0 / (dh ** 0.5)
    return pl.pallas_call(
        functools.partial(_attn_block_kernel, num_heads=num_heads,
                          scale=scale, eps=eps),
        out_shape=jax.ShapeDtypeStruct((B, T, D), x.dtype),
        grid=(B,),
        in_specs=[pl.BlockSpec((1, T, D), lambda i: (i, 0, 0)),
                  pl.BlockSpec((1, 1, D), lambda i: (0, 0, 0)),
                  pl.BlockSpec((1, 1, D), lambda i: (0, 0, 0)),
                  pl.BlockSpec((D, 3 * D), lambda i: (0, 0)),
                  pl.BlockSpec((1, 1, 3 * D), lambda i: (0, 0, 0)),
                  pl.BlockSpec((D, D), lambda i: (0, 0)),
                  pl.BlockSpec((1, 1, D), lambda i: (0, 0, 0))],
        out_specs=pl.BlockSpec((1, T, D), lambda i: (i, 0, 0)),
        compiler_params=_PARALLEL_1D,
    )(x, p["ln1_g"].reshape(1, 1, D), p["ln1_b"].reshape(1, 1, D),
      p["qkv_w"], p["qkv_b"].reshape(1, 1, 3 * D),
      p["proj_w"], p["proj_b"].reshape(1, 1, D))


def _ln_mlp_res_kernel(x_ref, g_ref, b_ref, w1_ref, b1_ref, w2_ref, b2_ref,
                       o_ref, *, eps):
    x = x_ref[...].astype(jnp.float32)
    mu = jnp.mean(x, axis=-1, keepdims=True)
    var = jnp.mean(jnp.square(x - mu), axis=-1, keepdims=True)
    y = (x - mu) * jax.lax.rsqrt(var + eps)
    y = y * g_ref[...] + b_ref[...]
    h = jnp.dot(y.astype(jnp.bfloat16), w1_ref[...].astype(jnp.bfloat16),
                preferred_element_type=jnp.float32) + b1_ref[...]
    # TODO(synk): PyTorch uses exact (erf) GELU; tanh approximation used here.
    h = jax.nn.gelu(h, approximate=True)
    o = jnp.dot(h.astype(jnp.bfloat16), w2_ref[...].astype(jnp.bfloat16),
                preferred_element_type=jnp.float32) + b2_ref[...]
    o_ref[...] = (x + o).astype(o_ref.dtype)


def pallas_ln_mlp_res(x2d, gamma, beta, w1, b1, w2, b2, eps=1e-5):
    """Fused x + MLP(LN(x)), row-tiled over B*T."""
    n, d = x2d.shape
    dh = w1.shape[1]
    bn = _row_block(n)
    return pl.pallas_call(
        functools.partial(_ln_mlp_res_kernel, eps=eps),
        out_shape=jax.ShapeDtypeStruct((n, d), x2d.dtype),
        grid=(n // bn,),
        in_specs=[pl.BlockSpec((bn, d), lambda i: (i, 0)),
                  pl.BlockSpec((1, d), lambda i: (0, 0)),
                  pl.BlockSpec((1, d), lambda i: (0, 0)),
                  pl.BlockSpec((d, dh), lambda i: (0, 0)),
                  pl.BlockSpec((1, dh), lambda i: (0, 0)),
                  pl.BlockSpec((dh, d), lambda i: (0, 0)),
                  pl.BlockSpec((1, d), lambda i: (0, 0))],
        out_specs=pl.BlockSpec((bn, d), lambda i: (i, 0)),
        compiler_params=_PARALLEL_1D,
    )(x2d, gamma.reshape(1, d), beta.reshape(1, d),
      w1, b1.reshape(1, dh), w2, b2.reshape(1, d))


def _encnorm_decembed_kernel(x_ref, g_ref, b_ref, w_ref, bias_ref, pos_ref,
                             mem_ref, y_ref, *, eps):
    """Dual output: mem = LN(x);  y = mem @ W_dec + b_dec + dec_pos_embed."""
    f32, bf16 = jnp.float32, jnp.bfloat16
    x = x_ref[0].astype(f32)
    mu = jnp.mean(x, axis=-1, keepdims=True)
    var = jnp.mean(jnp.square(x - mu), axis=-1, keepdims=True)
    ln = (x - mu) * jax.lax.rsqrt(var + eps) * g_ref[0] + b_ref[0]
    mem_ref[0] = ln.astype(mem_ref.dtype)
    acc = jnp.dot(ln.astype(bf16), w_ref[...].astype(bf16),
                  preferred_element_type=f32)
    y_ref[0] = (acc + bias_ref[0] + pos_ref[0].astype(f32)).astype(y_ref.dtype)


def pallas_encnorm_decembed(h, gamma, beta, w, b, dec_pos, eps=1e-5):
    """h: [B, T, D] -> (mem [B, T, D], y [B, T, DD]) in one pass."""
    B, T, D = h.shape
    DD = w.shape[1]
    return pl.pallas_call(
        functools.partial(_encnorm_decembed_kernel, eps=eps),
        out_shape=(jax.ShapeDtypeStruct((B, T, D), h.dtype),
                   jax.ShapeDtypeStruct((B, T, DD), h.dtype)),
        grid=(B,),
        in_specs=[pl.BlockSpec((1, T, D), lambda i: (i, 0, 0)),
                  pl.BlockSpec((1, 1, D), lambda i: (0, 0, 0)),
                  pl.BlockSpec((1, 1, D), lambda i: (0, 0, 0)),
                  pl.BlockSpec((D, DD), lambda i: (0, 0)),
                  pl.BlockSpec((1, 1, DD), lambda i: (0, 0, 0)),
                  pl.BlockSpec((1, T, DD), lambda i: (0, 0, 0))],
        out_specs=[pl.BlockSpec((1, T, D), lambda i: (i, 0, 0)),
                   pl.BlockSpec((1, T, DD), lambda i: (i, 0, 0))],
        compiler_params=_PARALLEL_1D,
    )(h, gamma.reshape(1, 1, D), beta.reshape(1, 1, D),
      w, b.reshape(1, 1, DD), dec_pos)


def _ln_linear_kernel(x_ref, g_ref, b_ref, w_ref, bias_ref, o_ref, *, eps):
    x = x_ref[...].astype(jnp.float32)
    mu = jnp.mean(x, axis=-1, keepdims=True)
    var = jnp.mean(jnp.square(x - mu), axis=-1, keepdims=True)
    y = (x - mu) * jax.lax.rsqrt(var + eps)
    y = y * g_ref[...] + b_ref[...]
    acc = jnp.dot(y.astype(jnp.bfloat16), w_ref[...].astype(jnp.bfloat16),
                  preferred_element_type=jnp.float32)
    o_ref[...] = (acc + bias_ref[...]).astype(o_ref.dtype)


def pallas_ln_linear(x2d, gamma, beta, w, b, eps=1e-5):
    """Fused LayerNorm + Linear:  (LN(x) @ W) + b."""
    n, din = x2d.shape
    dout = w.shape[1]
    bn = _row_block(n)
    return pl.pallas_call(
        functools.partial(_ln_linear_kernel, eps=eps),
        out_shape=jax.ShapeDtypeStruct((n, dout), x2d.dtype),
        grid=(n // bn,),
        in_specs=[pl.BlockSpec((bn, din), lambda i: (i, 0)),
                  pl.BlockSpec((1, din), lambda i: (0, 0)),
                  pl.BlockSpec((1, din), lambda i: (0, 0)),
                  pl.BlockSpec((din, dout), lambda i: (0, 0)),
                  pl.BlockSpec((1, dout), lambda i: (0, 0))],
        out_specs=pl.BlockSpec((bn, dout), lambda i: (i, 0)),
        compiler_params=_PARALLEL_1D,
    )(x2d, gamma.reshape(1, din), beta.reshape(1, din), w, b.reshape(1, dout))


def _regressor_kernel(x_ref, ip_ref, is_ref, ic_ref,
                      w1x_ref, w1p_ref, w1s_ref, w1c_ref, b1_ref,
                      w2_ref, b2_ref,
                      wp_ref, bp_ref, ws_ref, bs_ref, wc_ref, bc_ref,
                      pose_ref, shape_ref, cam_ref, xc_ref, *, n_iter):
    """SPIN iterative regressor, all 3 iterations fused (f32, tiny weights)."""
    f32 = jnp.float32
    x = x_ref[...].astype(f32)
    pose = ip_ref[...].astype(f32)
    shp = is_ref[...].astype(f32)
    cam = ic_ref[...].astype(f32)
    h = None
    for _ in range(n_iter):
        # fc1 on the implicit concat [x, pose, shape, cam] via split weights
        h = (jnp.dot(x, w1x_ref[...], preferred_element_type=f32)
             + jnp.dot(pose, w1p_ref[...], preferred_element_type=f32)
             + jnp.dot(shp, w1s_ref[...], preferred_element_type=f32)
             + jnp.dot(cam, w1c_ref[...], preferred_element_type=f32)
             + b1_ref[...])
        h = jnp.dot(h, w2_ref[...], preferred_element_type=f32) + b2_ref[...]
        pose = jnp.dot(h, wp_ref[...], preferred_element_type=f32) + bp_ref[...] + pose
        shp = jnp.dot(h, ws_ref[...], preferred_element_type=f32) + bs_ref[...] + shp
        cam = jnp.dot(h, wc_ref[...], preferred_element_type=f32) + bc_ref[...] + cam
    pose_ref[...] = pose.astype(pose_ref.dtype)
    shape_ref[...] = shp.astype(shape_ref.dtype)
    cam_ref[...] = cam.astype(cam_ref.dtype)
    xc_ref[...] = h.astype(xc_ref.dtype)


def pallas_regressor(x, rp, n_iter=3):
    N, feat = x.shape
    npose = rp["decpose_w"].shape[1]
    hidden = rp["fc1_w"].shape[1]
    # split fc1 weight along the contraction dim (avoids in-kernel concat)
    w1x = rp["fc1_w"][:feat]
    w1p = rp["fc1_w"][feat:feat + npose]
    w1s = rp["fc1_w"][feat + npose:feat + npose + 10]
    w1c = rp["fc1_w"][feat + npose + 10:]
    init_pose = jnp.tile(rp["init_pose"][None], (N, 1))
    init_shape = jnp.tile(rp["init_shape"][None], (N, 1))
    init_cam = jnp.tile(rp["init_cam"][None], (N, 1))
    out_shapes = (jax.ShapeDtypeStruct((N, npose), x.dtype),
                  jax.ShapeDtypeStruct((N, 10), x.dtype),
                  jax.ShapeDtypeStruct((N, 3), x.dtype),
                  jax.ShapeDtypeStruct((N, hidden), x.dtype))
    return pl.pallas_call(
        functools.partial(_regressor_kernel, n_iter=n_iter),
        out_shape=out_shapes,
    )(x, init_pose, init_shape, init_cam,
      w1x, w1p, w1s, w1c, rp["fc1_b"].reshape(1, -1),
      rp["fc2_w"], rp["fc2_b"].reshape(1, -1),
      rp["decpose_w"], rp["decpose_b"].reshape(1, -1),
      rp["decshape_w"], rp["decshape_b"].reshape(1, -1),
      rp["deccam_w"], rp["deccam_b"].reshape(1, -1))


# --------------------------------------------------------------------------
# Model pieces built from the Pallas kernels (glue in plain JAX)
# --------------------------------------------------------------------------
def transformer_block(x, p, num_heads):
    """Pre-norm block, 2 fused pallas_calls.  x: [B, T, D]."""
    B, T, D = x.shape
    x = pallas_attn_block(x, p, num_heads)                       # LN1+QKV+attn+proj+res
    x2d = pallas_ln_mlp_res(x.reshape(B * T, D), p["ln2_g"], p["ln2_b"],
                            p["fc1_w"], p["fc1_b"], p["fc2_w"], p["fc2_b"])
    return x2d.reshape(B, T, D)


def rot6d_to_rotmat(x):
    """x: [N, 24*6] -> [N*24, 3, 3] (SPIN convention)."""
    x = x.reshape(-1, 3, 2)
    a1, a2 = x[:, :, 0], x[:, :, 1]
    b1 = a1 / (jnp.linalg.norm(a1, axis=-1, keepdims=True) + 1e-8)
    b2 = a2 - jnp.sum(b1 * a2, axis=-1, keepdims=True) * b1
    b2 = b2 / (jnp.linalg.norm(b2, axis=-1, keepdims=True) + 1e-8)
    b3 = jnp.cross(b1, b2)
    return jnp.stack([b1, b2, b3], axis=-1)


def regressor_forward(rp, x, n_iter=3):
    """SPIN-style iterative regressor.  x: [N, feat]."""
    N = x.shape[0]
    pred_pose, pred_shape, pred_cam, xc = pallas_regressor(x, rp, n_iter=n_iter)
    rotmat = rot6d_to_rotmat(pred_pose).reshape(N, 24, 3, 3)
    theta = jnp.concatenate([pred_cam, pred_pose, pred_shape], axis=1)
    # TODO(synk): SMPL body model (mesh verts, 3D joints, weak-persp 2D projection)
    # needs SMPL template/J_regressor data not available in-script; zeros emitted.
    verts = jnp.zeros((N, 6890, 3), x.dtype)
    kp_3d = jnp.zeros((N, 49, 3), x.dtype)
    kp_2d = jnp.zeros((N, 49, 2), x.dtype)
    out = {"theta": theta, "verts": verts, "kp_2d": kp_2d,
           "kp_3d": kp_3d, "rotmat": rotmat}
    return [out], xc


def gmm_forward(params, x):
    """Inference path of GMM.forward (is_train=False, context_feature=None)."""
    B, T, Din = x.shape
    d = params["proj_w"].shape[1]
    nh = params["num_head"]

    # fused input projection + encoder positional embedding
    h = pallas_proj_posadd(x, params["proj_w"], params["proj_b"],
                           params["pos_embed"])

    # encoder (mask_flag=False -> no masking, ids_restore = identity)
    for blk in params["enc_blocks"]:
        h = transformer_block(h, blk, nh)

    # fused encoder-norm (mem) + decoder embed + decoder positional embedding
    mem, y = pallas_encnorm_decembed(h, params["enc_norm_g"], params["enc_norm_b"],
                                     params["dec_embed_w"], params["dec_embed_b"],
                                     params["decoder_pos_embed"])
    mask_ids = None

    dd = d // 2
    for blk in params["dec_blocks"]:
        y = transformer_block(y, blk, nh)

    # centre-frame selection first (per-row ops -> identical result), then
    # fused decoder-norm + out_proj on just the B selected rows.
    y_center = y[:, T // 2]                                   # [B, dd]
    feature = pallas_ln_linear(y_center,
                               params["dec_norm_g"], params["dec_norm_b"],
                               params["out_proj_w"], params["out_proj_b"])

    smpl_output_global, pred_global = regressor_forward(
        params["reg"], feature, n_iter=3)

    size = 1                                                  # is_train=False
    scores = None
    for s in smpl_output_global:
        s["theta"] = s["theta"].reshape(B, size, -1)
        s["verts"] = s["verts"].reshape(B, size, -1, 3)
        s["kp_2d"] = s["kp_2d"].reshape(B, size, -1, 2)
        s["kp_3d"] = s["kp_3d"].reshape(B, size, -1, 3)
        s["rotmat"] = s["rotmat"].reshape(B, size, -1, 3, 3)
        s["scores"] = scores
    return smpl_output_global, mask_ids, mem, pred_global


# --------------------------------------------------------------------------
# Deterministic parameter initialization (xavier linears, N(0,.02) pos emb)
# Transformer matmul weights stored in bf16 (MXU operands); LN params, biases,
# positional embeddings and the regressor stay f32.
# --------------------------------------------------------------------------
def _xavier(key, shape, dtype=jnp.float32):
    return jax.nn.initializers.xavier_uniform()(key, shape, jnp.float32).astype(dtype)


def _init_block(key, dim, mlp_hidden):
    ks = jax.random.split(key, 4)
    f32, bf16 = jnp.float32, jnp.bfloat16
    return dict(
        ln1_g=jnp.ones((dim,), f32), ln1_b=jnp.zeros((dim,), f32),
        qkv_w=_xavier(ks[0], (dim, 3 * dim), bf16), qkv_b=jnp.zeros((3 * dim,), f32),
        proj_w=_xavier(ks[1], (dim, dim), bf16), proj_b=jnp.zeros((dim,), f32),
        ln2_g=jnp.ones((dim,), f32), ln2_b=jnp.zeros((dim,), f32),
        fc1_w=_xavier(ks[2], (dim, mlp_hidden), bf16), fc1_b=jnp.zeros((mlp_hidden,), f32),
        fc2_w=_xavier(ks[3], (mlp_hidden, dim), bf16), fc2_b=jnp.zeros((dim,), f32),
    )


def init_gmm_params(key, *, seqlen, n_layers, d_model, num_head,
                    init_d_model, out_d_model, reg_hidden=128):
    f32, bf16 = jnp.float32, jnp.bfloat16
    dd = d_model // 2
    npose = 24 * 6
    keys = iter(jax.random.split(key, 32 + 2 * n_layers))

    params = dict(
        num_head=num_head,
        proj_w=_xavier(next(keys), (init_d_model, d_model), bf16),
        proj_b=jnp.zeros((d_model,), f32),
        pos_embed=0.02 * jax.random.normal(next(keys), (1, seqlen, d_model), f32),
        decoder_pos_embed=0.02 * jax.random.normal(next(keys), (1, seqlen, dd), f32),
        enc_blocks=[_init_block(next(keys), d_model, d_model * 4)
                    for _ in range(n_layers)],
        enc_norm_g=jnp.ones((d_model,), f32), enc_norm_b=jnp.zeros((d_model,), f32),
        dec_embed_w=_xavier(next(keys), (d_model, dd), bf16),
        dec_embed_b=jnp.zeros((dd,), f32),
        dec_blocks=[_init_block(next(keys), dd, dd * 4) for _ in range(n_layers)],
        dec_norm_g=jnp.ones((dd,), f32), dec_norm_b=jnp.zeros((dd,), f32),
        out_proj_w=_xavier(next(keys), (dd, out_d_model), bf16),
        out_proj_b=jnp.zeros((out_d_model,), f32),
    )
    reg_in = out_d_model + npose + 10 + 3
    # identity-like 6d rotation per joint -> rotmat ~ I at init
    init_pose = jnp.tile(jnp.array([1., 0., 0., 1., 0., 0.], f32), (24,))
    params["reg"] = dict(
        fc1_w=_xavier(next(keys), (reg_in, reg_hidden)), fc1_b=jnp.zeros((reg_hidden,), f32),
        fc2_w=_xavier(next(keys), (reg_hidden, reg_hidden)), fc2_b=jnp.zeros((reg_hidden,), f32),
        decpose_w=_xavier(next(keys), (reg_hidden, npose)), decpose_b=jnp.zeros((npose,), f32),
        decshape_w=_xavier(next(keys), (reg_hidden, 10)), decshape_b=jnp.zeros((10,), f32),
        deccam_w=_xavier(next(keys), (reg_hidden, 3)), deccam_b=jnp.zeros((3,), f32),
        init_pose=init_pose,
        init_shape=jnp.zeros((10,), f32),
        init_cam=jnp.array([0.9, 0., 0.], f32),
    )
    return params


# --------------------------------------------------------------------------
if __name__ == "__main__":
    B, T = 2, 8
    init_d_model = 64
    d_model = 64
    num_head = 4
    out_d_model = 64
    n_layers = 1

    key = jax.random.PRNGKey(0)
    pkey, xkey = jax.random.split(key)
    params = init_gmm_params(pkey, seqlen=T, n_layers=n_layers, d_model=d_model,
                             num_head=num_head, init_d_model=init_d_model,
                             out_d_model=out_d_model)
    x = jax.random.normal(xkey, (B, T, init_d_model), jnp.float32)

    smpl_output_global, mask_ids, mem, pred_global = gmm_forward(params, x)

    jax.block_until_ready(mem)
    jax.block_until_ready(pred_global)
    jax.block_until_ready(smpl_output_global[0]["theta"])
    jax.block_until_ready(smpl_output_global[0]["rotmat"])
    print("KERNEL_OK")
</pallas_src>

<mosaic_0001>
module attributes {stable_mosaic.version = 11 : i64} {
  func.func @_proj_posadd_kernel(%arg0: i32, %arg1: memref<1x8x64xf32, #tpu.memory_space<vmem>>, %arg2: memref<64x64xbf16, #tpu.memory_space<vmem>>, %arg3: memref<1x1x64xf32, #tpu.memory_space<vmem>>, %arg4: memref<1x8x64xf32, #tpu.memory_space<vmem>>, %arg5: memref<1x8x64xf32, #tpu.memory_space<vmem>>) attributes {dimension_semantics = [#tpu.dimension_semantics<parallel>], iteration_bounds = array<i64: 2>, scalar_prefetch = 0 : i64, scratch_operands = 0 : i64, tpu.core_type = #tpu.core_type<tc>, window_params = [{transform_indices = @transform_0, window_bounds = array<i64: 1, 8, 64>}, {pipeline_mode = #tpu.pipeline_mode<synchronous>, transform_indices = @transform_1, window_bounds = array<i64: 64, 64>}, {pipeline_mode = #tpu.pipeline_mode<synchronous>, transform_indices = @transform_2, window_bounds = array<i64: 1, 1, 64>}, {pipeline_mode = #tpu.pipeline_mode<synchronous>, transform_indices = @transform_3, window_bounds = array<i64: 1, 8, 64>}, {transform_indices = @transform_4, window_bounds = array<i64: 1, 8, 64>}]} {
    %c0 = arith.constant 0 : index
    %c0_0 = arith.constant 0 : index
    %c0_1 = arith.constant 0 : index
    %0 = vector.load %arg1[%c0, %c0_0, %c0_1] : memref<1x8x64xf32, #tpu.memory_space<vmem>>, vector<1x8x64xf32>
    %1 = vector.shape_cast %0 : vector<1x8x64xf32> to vector<8x64xf32>
    %2 = arith.truncf %1 : vector<8x64xf32> to vector<8x64xbf16>
    %c0_2 = arith.constant 0 : index
    %c0_3 = arith.constant 0 : index
    %3 = vector.load %arg2[%c0_2, %c0_3] : memref<64x64xbf16, #tpu.memory_space<vmem>>, vector<64x64xbf16>
    %cst = arith.constant dense<0.000000e+00> : vector<8x64xf32>
    %4 = tpu.matmul %2, %3, %cst {dimension_numbers = #tpu.dot_dimension_numbers<[1], [0], [0], [1], [0, 0, 1, 1], [], []>} : vector<8x64xbf16>, vector<64x64xbf16>, vector<8x64xf32> -> vector<8x64xf32>
    %c0_4 = arith.constant 0 : index
    %c0_5 = arith.constant 0 : index
    %c0_6 = arith.constant 0 : index
    %5 = vector.load %arg3[%c0_4, %c0_5, %c0_6] : memref<1x1x64xf32, #tpu.memory_space<vmem>>, vector<1x1x64xf32>
    %6 = vector.shape_cast %5 : vector<1x1x64xf32> to vector<1x64xf32>
    %7 = vector.broadcast %6 : vector<1x64xf32> to vector<8x64xf32>
    %8 = arith.addf %4, %7 : vector<8x64xf32>
    %c0_7 = arith.constant 0 : index
    %c0_8 = arith.constant 0 : index
    %c0_9 = arith.constant 0 : index
    %9 = vector.load %arg4[%c0_7, %c0_8, %c0_9] : memref<1x8x64xf32, #tpu.memory_space<vmem>>, vector<1x8x64xf32>
    %10 = vector.shape_cast %9 : vector<1x8x64xf32> to vector<8x64xf32>
    %11 = arith.addf %8, %10 : vector<8x64xf32>
    %c0_10 = arith.constant 0 : index
    %c0_11 = arith.constant 0 : index
    %c0_12 = arith.constant 0 : index
    %12 = vector.load %arg5[%c0_10, %c0_11, %c0_12] : memref<1x8x64xf32, #tpu.memory_space<vmem>>, vector<1x8x64xf32>
    %13 = vector.shape_cast %12 : vector<1x8x64xf32> to vector<8x64xf32>
    %14 = vector.shape_cast %11 : vector<8x64xf32> to vector<1x8x64xf32>
    tpu.vector_store %arg5[%c0_10, %c0_11, %c0_12], %14 {strides = array<i32>} : memref<1x8x64xf32, #tpu.memory_space<vmem>>, vector<1x8x64xf32>,
    return
  }
  func.func @transform_0(%arg0: i32) -> (i32, i32, i32) {
    %c0_i32 = arith.constant 0 : i32
    %c0_i32_0 = arith.constant 0 : i32
    %c0_i32_1 = arith.constant 0 : i32
    return %arg0, %c0_i32, %c0_i32_0 : i32, i32, i32
  }
  func.func @transform_1(%arg0: i32) -> (i32, i32) {
    %c0_i32 = arith.constant 0 : i32
    %c0_i32_0 = arith.constant 0 : i32
    %c0_i32_1 = arith.constant 0 : i32
    return %c0_i32, %c0_i32_0 : i32, i32
  }
  func.func @transform_2(%arg0: i32) -> (i32, i32, i32) {
    %c0_i32 = arith.constant 0 : i32
    %c0_i32_0 = arith.constant 0 : i32
    %c0_i32_1 = arith.constant 0 : i32
    %c0_i32_2 = arith.constant 0 : i32
    return %c0_i32, %c0_i32_0, %c0_i32_1 : i32, i32, i32
  }
  func.func @transform_3(%arg0: i32) -> (i32, i32, i32) {
    %c0_i32 = arith.constant 0 : i32
    %c0_i32_0 = arith.constant 0 : i32
    %c0_i32_1 = arith.constant 0 : i32
    %c0_i32_2 = arith.constant 0 : i32
    return %c0_i32, %c0_i32_0, %c0_i32_1 : i32, i32, i32
  }
  func.func @transform_4(%arg0: i32) -> (i32, i32, i32) {
    %c0_i32 = arith.constant 0 : i32
    %c0_i32_0 = arith.constant 0 : i32
    %c0_i32_1 = arith.constant 0 : i32
    return %arg0, %c0_i32, %c0_i32_0 : i32, i32, i32
  }
}

</mosaic_0001>

<bundles_post_ra>
// kernel: tpu_custom_call.1
= control target key start
LH: loop header
LB: loop body
LE: loop exit
PB: predicated region body
PF: predicated region fallthrough
CT: control target
= control target key end

     0   :  { %9 = vsyncpa [#allocation3], 0  ;;  %s881_s0 = inlined_call_operand.hbm [shape: f32[2,8,64], index: 0, kind: input, shape index: {}]   ;;  %s882_s1 = inlined_call_operand.hbm [shape: bf16[64,64], index: 1, kind: input, shape index: {}]   ;;  %s883_s2 = inlined_call_operand.vmem [shape: f32[1,1,64], index: 2, kind: input, shape index: {}]   ;;  %s884_s3 = inlined_call_operand.vmem [shape: f32[1,8,64], index: 3, kind: input, shape index: {}]   ;;  %s885_s4 = inlined_call_operand.hbm [shape: f32[2,8,64], index: 4, kind: output, shape index: {}]  }
   0x1   :  { %11 = vsyncpa [#allocation3 + $0x1], 0 }
   0x2   :  { %12 = vsyncpa [#allocation6], 0 }
   0x3   :  { %13 = vsyncpa [#allocation4], 0 }
   0x4   :  { %15 = vsyncpa [#allocation4 + $0x1], 0  ;;  %s675_s15 = smov 0   ;;  %s677_s16 = smov 0  }
   0x5   :  { %s679_s17 = smov 0   ;;  %s681_s18 = smov 0  }
   0x6 LB: > { %s696_s19 = sadd.s32 4294967295, %s641_s18   ;;  %s411_s20 = sadd.s32 4294967294, %s641_s18   ;;  %s641_s18 = sphi %s681_s18, %s905_s18   ;;  %s637_s17 = sphi %s679_s17, %s904_s17   ;;  %s633_s16 = sphi %s677_s16, %s903_s16   ;;  %s629_s15 = sphi %s675_s15, %s902_s15  }
   0x7   : > { %p41_p0 = scmp.ne.s32.totalorder %s633_s16, %s629_s15  ;;  %p886_p1 = scmp.eq.s32.totalorder %s696_s19, 0 }
   0x8   : > { %p134_p3 = scmp.eq.s32.totalorder %s411_s20, 1  ;;  %p412_p5 = scmp.ge.s32.totalorder %s641_s18, 1 }
   0x9   : > { %p705_p4 = por %p886_p1, %p41_p0  ;;  %p141_p7 = scmp.lt.s32.totalorder %s641_s18, 3 }
   0xa   : > { %p710_p6 = por %p134_p3, %p41_p0  ;;  %s643_s24 = smov [#allocation5]  }
   0xb   : > { %s889_s21 = scalar_select %p705_p4, 1, 0 }
   0xc   : > { %s890_s22 = scalar_select %p710_p6, 1, 0 }
   0xd   : > { %p715_p8 = pnand %p412_p5, %p141_p7  ;;  %s153_s25 = sshll.u32 %s643_s24, 4  ;;  %s719_s25 = int_to_ptr.vmem [resolvable:$true] %s153_s25 }
   0xe   : > { %s731_s27 = sadd.s32 1, %s641_s18   ;;  %s28_s28 = sadd.s32 1, %s637_s17 }
   0xf   : > { %s891_s23 = scalar_select %p715_p8, 1, 0 }
  0x10   : > { %p456_p9 = pneg %p715_p8  ;;  %s25_s29 = ssub.s32 %s641_s18, %s731_s27 }
  0x11   : > { %s513_s6 = scalar_lea.hbm %s882_s1, 512 }
  0x12   : > { %p726_p11 = pnand %p456_p9, %p886_p1  ;;  %p514_p12 = scmp.ne.s32.totalorder %s882_s1, %s513_s6 }
  0x13   : > { %p520_p5 = scmp.lt.u32.totalorder %s513_s6, %s882_s1 }
  0x14   : > { %p515_p13 = pneg %p726_p11 }
  0x16   : > { %p516_p0 = pnand %p515_p13, %p514_p12 }
  0x18   : > { %p517_p3 = pneg %p516_p0 }
  0x1a   : > { %p522_p7 = pnand %p520_p5, %p517_p3 }
  0x1c   : > { %525 = shalt.err (!%p522_p7)
}
  0x1d   : > { %s526_s11 = scalar_lea.vmem %s719_s25, 512  ;;  %p534_p2 = scmp.lt.s32.totalorder %s719_s25, %s719_s25 }
  0x1e   : > { %p527_p9 = scmp.ne.s32.totalorder %s719_s25, %s526_s11  ;;  %p535_p6 = scmp.lt.s32.totalorder %s526_s11, %s526_s11 }
  0x20   : > { %p529_p10 = pnand %p527_p9, %p515_p13  ;;  %p536_p4 = por %p535_p6, %p534_p2 }
  0x22   : > { %p530_p1 = pneg %p529_p10 }
  0x24   : > { %p537_p8 = pnand %p536_p4, %p530_p1 }
  0x26   : > { %540 = shalt.err (!%p537_p8)
}
  0x27   : > { %s644_s12 = smov 64   ;;  %s645_s13 = smov 4  }
  0x28   : > { %459 = dma.hbm_to_vmem [thread:$0]  (!%p726_p11), %s882_s1, 512, %s719_s25, [#allocation6], %s644_s12, %s644_s12, %s645_s13  }
  0x29   : > { %p26_p2 = scmp.eq.s32.totalorder %s25_s29, 0  ;;  %p35_p1 = scmp.ne.s32.totalorder %s637_s17, %s633_s16 }
  0x2a   : > { %p36_p4 = scmp.eq.s32.totalorder %s641_s18, 0  ;;  %p469_p6 = scmp.lt.s32.totalorder %s641_s18, 2 }
  0x2b   : > { %s762_s24 = scalar_select %p26_p2, %s637_s17, %s28_s28  }
  0x2c   : > { %p37_p8 = por %p36_p4, %p35_p1  ;;  %p893_p10 = scmp.eq.s32.totalorder %s696_s19, 1 }
  0x2d   : > { %s173_s5 = sand.u32 1, %s637_s17   ;;  %s416_s6 = sshll.u32 %s641_s18, 7 }
  0x2e   : > { %p766_p12 = por %p893_p10, %p35_p1  ;;  %s415_s7 = sshll.u32 %s173_s5, 3 }
  0x2f   : > { %s775_s9 = scalar_lea.hbm %s881_s0, %s416_s6  ;;  %s177_s25 = scalar_lea.vmem [#allocation2], %s415_s7 }
  0x30   : > { %s184_s28 = sshll.u32 %s177_s25, 4  ;;  %p777_p11 = pnand %p469_p6, %p37_p8  ;;  %s781_s28 = int_to_ptr.vmem [resolvable:$true] %s184_s28 }
  0x31   : > { %s174_s10 = scalar_lea.sflag [#allocation3], %s173_s5  ;;  %s541_s11 = scalar_lea.hbm %s775_s9, 128 }
  0x32   : > { %p542_p13 = scmp.ne.s32.totalorder %s775_s9, %s541_s11  ;;  %p543_p0 = pneg %p777_p11 }
  0x33   : > { %s546_s14 = scalar_lea.hbm %s881_s0, 256  ;;  %p547_p7 = scmp.lt.u32.totalorder %s775_s9, %s881_s0 }
  0x34   : > { %p544_p3 = pnand %p543_p0, %p542_p13  ;;  %p548_p9 = scmp.lt.u32.totalorder %s546_s14, %s541_s11 }
  0x35   : > { %p550_p1 = scmp.lt.u32.totalorder %s541_s11, %s775_s9 }
  0x36   : > { %p545_p5 = pneg %p544_p3  ;;  %p549_p2 = por %p548_p9, %p547_p7 }
  0x38   : > { %p551_p4 = por %p550_p1, %p549_p2 }
  0x3a   : > { %p552_p6 = pnand %p551_p4, %p545_p5 }
  0x3c   : > { %555 = shalt.err (!%p552_p6)
}
  0x3d   : > { %s556_s5 = scalar_lea.vmem %s781_s28, 128  ;;  %s646_s7 = smov [#allocation2]  }
  0x3e   : > { %p557_p8 = scmp.ne.s32.totalorder %s781_s28, %s556_s5  ;;  %s561_s26 = sshll.u32 %s646_s7, 4  ;;  %s562_s26 = int_to_ptr.vmem [resolvable:$false] %s561_s26 }
  0x3f   : > { %s563_s8 = scalar_lea.vmem %s562_s26, 256  ;;  %p564_p3 = scmp.lt.s32.totalorder %s781_s28, %s562_s26 }
  0x40   : > { %p559_p10 = pnand %p557_p8, %p543_p0  ;;  %p565_p7 = scmp.lt.s32.totalorder %s563_s8, %s556_s5 }
  0x42   : > { %p560_p13 = pneg %p559_p10  ;;  %p566_p9 = por %p565_p7, %p564_p3 }
  0x44   : > { %p567_p2 = pnand %p566_p9, %p560_p13 }
  0x46   : > { %570 = shalt.err (!%p567_p2)
}
  0x47   : > { %463 = dma.hbm_to_vmem [thread:$0]  (!%p777_p11), %s775_s9, 128, %s781_s28, %s174_s10  }
  0x48   : > { %p896_p5 = scmp.ne.s32.totalorder %s891_s23, 0 }
  0x49   : > { %s811_s25 = sand.u32 (!%p896_p5), 1, %s633_s16   ;;  %p897_p0 = scmp.ne.s32.totalorder (!%p896_p5), %s889_s21, 0 }
  0x4a   : > { %193 = sbr.rel (%p896_p5) target bundleno = 332 (0x14c), region = 36  ;;  %s418_s11 = sshll.u32 (!%p896_p5), %s811_s25, 3 }
  0x4b   : > { %s196_s12 = scalar_lea.sflag (!%p896_p5), [#allocation3], %s811_s25  ;;  %s199_s13 = scalar_lea.vmem (!%p896_p5), [#allocation2], %s418_s11 }
  0x51   : > { %616 = dma.done.wait (%p897_p0), %s196_s12, 128  }
  0x52   : > { %618 = vsyncadd (%p897_p0), %s196_s12, 4294967168  ;;  %p898_p11 = scmp.eq.s32.totalorder %s696_s19, 0 }
  0x54   : > { %620 = dma.done.wait (%p898_p11), [#allocation6], 512   ;;  %p899_p1 = pmov %p898_p11 }
  0x55   : > { %v647_v0 = vmov 0.0   ;;  %vm648_vm0 = vmmov 0   ;;  %v509_v1 = vld [vmem:[#allocation5] sm:$0xff]   ;;  %v510_v2 = vld [vmem:[#allocation5 + $0x8] sm:$0xff]   ;;  %v511_v3 = vld [vmem:[#allocation5 + $0x10] sm:$0xff]   ;;  %vm270_vm1 = vcmask 523264  }
  0x56   : > { %622 = vsyncadd (%p899_p1), [#allocation6], 4294966784  ;;  %436 = vmatprep.subr.bf16.mxu0 %v647_v0  ;;  %444 = vmatprep.mubr.msk.bf16.mxu0 %vm648_vm0, %v647_v0  ;;  %v512_v4 = vld [vmem:[#allocation5 + $0x18] sm:$0xff]   ;;  %v421_v7 = vld [vmem:[%s883_s2] ss:$0 sm:$0xff]  ;;  %s428_s29 = sshll.u32 %s696_s19, 7 }
  0x57   : > { %437 = vmatpush3.bf16.msra.mxu0 %v509_v1  ;;  %v229_v5 = vld [vmem:[%s199_s13] sm:$0xff]  ;;  %s227_s10 = scalar_lea.vmem [#allocation7], %s418_s11  ;;  %s837_s5 = scalar_lea.hbm %s885_s4, %s428_s29 }
  0x58   : > { %438 = vmatprep.subr.bf16.mxu0 %v647_v0  ;;  %v230_v6 = vpack.c.bf16 %v229_v5, %v229_v5  ;;  %v314_v9 = vld [vmem:[%s884_s3] sm:$0xff]  ;;  %s331_s14 = sshll.u32 %s227_s10, 4  ;;  %s318_s19 = scalar_lea.sflag [#allocation4], %s811_s25  ;;  %s839_s14 = int_to_ptr.vmem [resolvable:$true] %s331_s14 }
  0x59   : > { %s571_s7 = scalar_lea.vmem %s839_s14, 128  ;;  %s649_s26 = smov [#allocation7]  }
  0x5a   : > { %p572_p4 = scmp.ne.s32.totalorder %s839_s14, %s571_s7  ;;  %s575_s8 = sshll.u32 %s649_s26, 4  ;;  %s576_s8 = int_to_ptr.vmem [resolvable:$false] %s575_s8 }
  0x5b   : > { %439 = vmatpush3.bf16.msra.mxu0 %v510_v2  ;;  %s577_s11 = scalar_lea.vmem %s576_s8, 256  ;;  %p578_p10 = scmp.lt.s32.totalorder %s839_s14, %s576_s8 }
  0x5c   : > { %440 = vmatprep.subr.bf16.mxu0 %v647_v0  ;;  %p573_p6 = pnand %p572_p4, %p766_p12  ;;  %p579_p13 = scmp.lt.s32.totalorder %s577_s11, %s571_s7 }
  0x5e   : > { %p574_p8 = pneg %p573_p6  ;;  %p580_p3 = por %p579_p13, %p578_p10 }
  0x5f   : > { %441 = vmatpush3.bf16.msra.mxu0 %v511_v3 }
  0x60   : > { %442 = vmatprep.subr.bf16.mxu0 %v647_v0  ;;  %p581_p7 = pnand %p580_p3, %p574_p8 }
  0x63   : > { %443 = vmatpush3.bf16.msra.mxu0 %v512_v4 }
  0x66   : > { %445 = vmatmul.mubr.msk.bf16.vlgmr.msra.gmra.mrb[0].mxu0 %vm270_vm1, %v230_v6 }
 0x139   : > { %v308_v8 = vpop.f32.mrb[0].mxu0 }
 0x13a   : > { %v309_v10 = vadd.f32 %v421_v7, %v308_v8  ;;  %v446_v11 = vpop.f32.mrb[1].mxu0 }
 0x13b   : > { %v311_v12 = vpop.f32.mrb[2].mxu0 }
 0x13c   : > { %v315_v13 = vadd.f32 %v314_v9, %v309_v10  ;;  %v447_v14 = vpop.f32.mrb[3].mxu0 }
 0x13e   : > { %316 = vst.msk [vmem:[%s227_s10] sm:$0xff] %vm270_vm1, %v315_v13 }
 0x13f   : > { %584 = shalt.err (!%p581_p7)
}
 0x140   : > { %s585_s25 = scalar_lea.hbm %s837_s5, 128  ;;  %s589_s21 = scalar_lea.hbm %s885_s4, 256 }
 0x141   : > { %p586_p9 = scmp.ne.s32.totalorder %s837_s5, %s585_s25  ;;  %p590_p0 = scmp.lt.u32.totalorder %s837_s5, %s885_s4 }
 0x142   : > { %p591_p11 = scmp.lt.u32.totalorder %s589_s21, %s585_s25  ;;  %p593_p4 = scmp.lt.u32.totalorder %s585_s25, %s837_s5 }
 0x143   : > { %p587_p2 = pnand %p586_p9, %p766_p12 }
 0x144   : > { %p592_p1 = por %p591_p11, %p590_p0 }
 0x145   : > { %p588_p5 = pneg %p587_p2 }
 0x146   : > { %p594_p6 = por %p593_p4, %p592_p1 }
 0x148   : > { %p595_p8 = pnand %p594_p6, %p588_p5 }
 0x14a   : > { %598 = shalt.err (!%p595_p8)
}
 0x14b   : > { %454 = dma.vmem_to_hbm [thread:$0]  (%p766_p12), %s839_s14, 128, %s837_s5, %s318_s19  }
 0x14c PF: > { %s343_s28 = sand.u32 1, %s629_s15   ;;  %p900_p10 = scmp.ne.s32.totalorder %s890_s22, 0 }
 0x14d   : > { %p901_p13 = scmp.ge.s32.totalorder %s641_s18, 2  ;;  %s344_s29 = scalar_lea.sflag [#allocation4], %s343_s28 }
 0x14f   : > { %p465_p3 = pnand %p901_p13, %p900_p10 }
 0x151   : > { %624 = dma.done.wait (!%p465_p3), %s344_s29, 128  }
 0x152   : > { %626 = vsyncadd (!%p465_p3), %s344_s29, 4294967168  ;;  %p18_p7 = scmp.ge.s32.totalorder %s731_s27, 4   ;;  %s902_s15 = smov %s633_s16 }
 0x153   : > { %s903_s16 = smov %s637_s17  ;;  %s904_s17 = smov %s762_s24 }
 0x154   : > { %s905_s18 = smov %s731_s27  ;;  %20 = sbr.rel (!%p18_p7) target bundleno = 6 (0x6), region = 85 }
 0x15b   :  { %349 = vsyncpa [#allocation3], 1 }
 0x15c   :  { %351 = vsyncpa [#allocation3 + $0x1], 1 }
 0x15d   :  { %352 = vsyncpa [#allocation6], 1 }
 0x15e   :  { %353 = vsyncpa [#allocation4], 1 }
 0x15f   :  { %355 = vsyncpa [#allocation4 + $0x1], 1 }

</bundles_post_ra>
